<compile_context>
chip_gen: v6e
topology: v6e:2x2x1
jax: 0.10.0
libtpu: 0.0.40
codegen_flags: <defaults>
</compile_context>

<pallas_src>
import functools

import jax
import jax.numpy as jnp
from jax import lax
from jax.experimental import pallas as pl
from jax.experimental.pallas import tpu as pltpu

LANE = 128  # per-label lane stride (TPU lane width)


def _round_up(x, m):
    return ((x + m - 1) // m) * m


def depgcn_kernel(src_ref, dst_ref, lbl_ref,   # int32 [1, Mp], padded with -1
                  x_ref,                       # bf16  [Np, D]
                  w_ref,                       # bf16  [D, L*LANE]
                  b_ref,                       # f32   [1, L*LANE]
                  scale_ref,                   # f32   [Np, LANE]  (dropout scale, ones if off)
                  out_ref,                     # f32   [Np, LANE]
                  *, num_labels):
    n = out_ref.shape[0]
    mp = src_ref.shape[1]

    # One lane-dense MXU matmul gives h_l = x @ W[l] + b[l] for EVERY label at once.
    h_all = jnp.dot(x_ref[...], w_ref[...],
                    preferred_element_type=jnp.float32) + b_ref[...]    # [Np, L*LANE] f32

    # Label-invariant edge masks, built once (hoisted out of the label loop).
    row_ids = lax.broadcasted_iota(jnp.int32, (n, mp), 0)                # [Np, Mp]
    dst = dst_ref[...]
    lbl = lbl_ref[...]
    dst_hit = dst == row_ids                                             # [Np, Mp] bool
    src_hit = (src_ref[...] == row_ids).astype(jnp.bfloat16)             # [Np, Mp] bf16

    # 'self' (label 0) Linear applied to every token row.  Label 0 never appears in
    # the message arrays, so it is excluded from the loop below.
    acc = h_all[:, 0:LANE]                                               # [Np, LANE] f32

    # Message term: one tiny adjacency matmul per real label, fully unrolled.
    for l in range(1, num_labels):
        d_l = jnp.logical_and(dst_hit, lbl == l).astype(jnp.bfloat16)    # [Np, Mp]
        # adj[d, s] = #messages (src=s, dst=d, label=l); small-int counts are exact.
        adj = lax.dot_general(d_l, src_hit,
                              dimension_numbers=(((1,), (1,)), ((), ())),
                              preferred_element_type=jnp.float32)        # [Np, Np]
        # h_all already contains +b[l]; adj's counts fold the per-message bias term.
        # Kept in f32: [Np,Np]x[Np,LANE] is negligible work and keeps numerics tight.
        acc = acc + jnp.dot(adj, h_all[:, l * LANE:(l + 1) * LANE],
                            preferred_element_type=jnp.float32)

    # Fused epilogue: ReLU + inverted-dropout scale, single lane-dense store.
    out_ref[...] = jnp.maximum(acc, 0.0) * scale_ref[...]


def prepare_params(w_stacked, b_stacked):
    """Pad + cast the stacked per-label Linear params ONCE (outside the per-forward jit).

    w_stacked: [L, D, D] with y = x @ W[l] + b[l];  b_stacked: [L, D].
    Returns wcat bf16 [D, L*LANE] and bcat f32 [1, L*LANE]; label l occupies lanes
    [l*LANE, l*LANE + D) so every in-kernel slice is 128-aligned.
    """
    L, D, Dout = w_stacked.shape
    w_pad = jnp.zeros((L, D, LANE), jnp.float32).at[:, :, :Dout].set(
        w_stacked.astype(jnp.float32))
    wcat = jnp.transpose(w_pad, (1, 0, 2)).reshape(D, L * LANE).astype(jnp.bfloat16)
    b_pad = jnp.zeros((L, LANE), jnp.float32).at[:, :Dout].set(
        b_stacked.astype(jnp.float32))
    bcat = b_pad.reshape(1, L * LANE)
    return wcat, bcat


@functools.partial(jax.jit, static_argnames=("dropout_rate", "is_dropout"))
def dep_gcn_forward(x, wcat, bcat, src, dst, lbl, key,
                    dropout_rate=0.1, is_dropout=True):
    """x: [N, D] tokens (f32). wcat/bcat from prepare_params. src/dst/lbl: int32 [M]."""
    N, D = x.shape
    L = wcat.shape[1] // LANE
    M = src.shape[0]

    Np = _round_up(max(N, 8), 8)
    Mp = _round_up(max(M, LANE), LANE)

    # bf16 MXU inputs; K dim (=D) deliberately NOT zero-padded to 128.
    x_p = jnp.zeros((Np, D), jnp.bfloat16).at[:N, :].set(x.astype(jnp.bfloat16))
    # -1 padding never matches a real row index or label.
    src_p = jnp.full((1, Mp), -1, jnp.int32).at[0, :M].set(src.astype(jnp.int32))
    dst_p = jnp.full((1, Mp), -1, jnp.int32).at[0, :M].set(dst.astype(jnp.int32))
    lbl_p = jnp.full((1, Mp), -1, jnp.int32).at[0, :M].set(lbl.astype(jnp.int32))

    # Inverted-dropout scale (torch training semantics), generated with jax.random in
    # the wrapper so the kernel also runs under interpret mode, fused as one multiply.
    # TODO(synk): on real HW this could use the in-kernel TPU PRNG
    # (pltpu.prng_seed / prng_random_bits) to drop the extra [Np,128] input.
    if is_dropout and float(dropout_rate) > 0.0:
        keep_prob = 1.0 - float(dropout_rate)
        if keep_prob <= 0.0:
            scale = jnp.zeros((Np, LANE), jnp.float32)
        else:
            keep = jax.random.bernoulli(key, keep_prob, (Np, LANE))
            scale = keep.astype(jnp.float32) * (1.0 / keep_prob)
    else:
        scale = jnp.ones((Np, LANE), jnp.float32)

    kernel = functools.partial(depgcn_kernel, num_labels=L)

    out = pl.pallas_call(
        kernel,
        out_shape=jax.ShapeDtypeStruct((Np, LANE), jnp.float32),
        grid=(1,),                                            # single step: all labels resident
        in_specs=[
            pl.BlockSpec((1, Mp), lambda i: (0, 0)),          # src
            pl.BlockSpec((1, Mp), lambda i: (0, 0)),          # dst
            pl.BlockSpec((1, Mp), lambda i: (0, 0)),          # lbl
            pl.BlockSpec((Np, D), lambda i: (0, 0)),          # x (K dim left at D)
            pl.BlockSpec((D, L * LANE), lambda i: (0, 0)),    # concatenated W (resident)
            pl.BlockSpec((1, L * LANE), lambda i: (0, 0)),    # concatenated b (resident)
            pl.BlockSpec((Np, LANE), lambda i: (0, 0)),       # dropout scale
        ],
        out_specs=pl.BlockSpec((Np, LANE), lambda i: (0, 0)),
        compiler_params=pltpu.CompilerParams(
            dimension_semantics=("arbitrary",)),
    )(src_p, dst_p, lbl_p, x_p, wcat, bcat, scale)

    # TODO(synk): for multi-sentence batches, add a 'parallel' sentence grid axis (pack
    # rows and offset src/dst per sentence) so both v7x TensorCores are used and the
    # MXU M-dimension is filled (Np=128-512 per block).
    return out[:N, :D]


# ----------------------------- glue / reference -----------------------------

def build_params(key, out_dim, num_labels):
    """Deterministic nn.Linear-style init: U(-1/sqrt(D), 1/sqrt(D))."""
    bound = 1.0 / jnp.sqrt(jnp.float32(out_dim))
    kw, kb = jax.random.split(key)
    # stored already transposed: y = x @ W[l] + b[l]
    w = jax.random.uniform(kw, (num_labels, out_dim, out_dim),
                           jnp.float32, -bound, bound)
    b = jax.random.uniform(kb, (num_labels, out_dim),
                           jnp.float32, -bound, bound)
    return w, b


def build_label_table(dependency_list, reverse_case):
    labels = ["self", "root"] + list(dependency_list)
    if reverse_case:
        labels = labels + [d + "_r" for d in dependency_list]
    return {name: i for i, name in enumerate(labels)}, len(labels)


def build_messages(dependency_triples, label_to_idx, reverse_case):
    """Flatten (dependent, label, governor) triples into (src, dst, lbl) int32 arrays."""
    src, dst, lbl = [], [], []
    for dependent, dep_label, governor in dependency_triples:
        src.append(governor)
        dst.append(dependent)
        lbl.append(label_to_idx[dep_label])
        if reverse_case:
            src.append(dependent)
            dst.append(governor)
            lbl.append(label_to_idx[dep_label + "_r"])
    return (jnp.asarray(src, jnp.int32),
            jnp.asarray(dst, jnp.int32),
            jnp.asarray(lbl, jnp.int32))


def reference_message_passing_relu(x, w, b, src, dst, lbl):
    """Pure-JAX reference mirroring PyTorch message_passing + relu."""
    out = x @ w[0] + b[0]
    for m in range(src.shape[0]):
        s, d, l = int(src[m]), int(dst[m]), int(lbl[m])
        out = out.at[d].add(x[s] @ w[l] + b[l])
    return jnp.maximum(out, 0.0)


if __name__ == "__main__":
    in_dim = 8     # number of tokens (rows of temp_tensor)
    out_dim = 32   # embedding / Linear size
    dependency_list = ["nsubj", "obj", "det"]
    reverse_case = True
    dropout_rate = 0.1

    label_to_idx, num_labels = build_label_table(dependency_list, reverse_case)

    key = jax.random.PRNGKey(0)
    k_x, k_p = jax.random.split(key, 2)

    x = jax.random.normal(k_x, (in_dim, out_dim), jnp.float32)
    w_stacked, b_stacked = build_params(k_p, out_dim, num_labels)

    # Pad + cast the label-stacked Linear params once (static across forwards).
    wcat, bcat = prepare_params(w_stacked, b_stacked)

    # (dependent, label, governor) triples over the 8 tokens.
    dependency_triples = [
        (0, "nsubj", 2),
        (1, "det", 0),
        (3, "obj", 2),
        (4, "det", 3),
        (6, "nsubj", 5),
    ]
    src, dst, lbl = build_messages(dependency_triples, label_to_idx, reverse_case)

    # Deterministic path (no dropout) — verify against the pure-JAX reference.
    out_nodrop = dep_gcn_forward(x, wcat, bcat, src, dst, lbl, jax.random.PRNGKey(1),
                                 dropout_rate=dropout_rate, is_dropout=False)
    out_nodrop = jax.block_until_ready(out_nodrop)

    # Reference uses the same bf16-rounded x / W that the kernel feeds the MXU
    # (f32 accumulation everywhere, same as the kernel).
    x_r = x.astype(jnp.bfloat16).astype(jnp.float32)
    w_r = w_stacked.astype(jnp.bfloat16).astype(jnp.float32)
    ref = reference_message_passing_relu(x_r, w_r, b_stacked, src, dst, lbl)
    assert jnp.allclose(out_nodrop, ref, atol=1e-3, rtol=1e-3), "mismatch vs reference"

    # Full forward: fused ReLU + inverted dropout (torch training-mode semantics).
    out_full = dep_gcn_forward(x, wcat, bcat, src, dst, lbl, jax.random.PRNGKey(123),
                               dropout_rate=dropout_rate, is_dropout=True)
    out_full = jax.block_until_ready(out_full)
    assert out_full.shape == (in_dim, out_dim)

    print("KERNEL_OK")
</pallas_src>

<mosaic_0001>
module attributes {stable_mosaic.version = 11 : i64} {
  func.func @depgcn_kernel(%arg0: i32, %arg1: memref<1x128xi32, #tpu.memory_space<vmem>>, %arg2: memref<1x128xi32, #tpu.memory_space<vmem>>, %arg3: memref<1x128xi32, #tpu.memory_space<vmem>>, %arg4: memref<8x32xbf16, #tpu.memory_space<vmem>>, %arg5: memref<32x1024xbf16, #tpu.memory_space<vmem>>, %arg6: memref<1x1024xf32, #tpu.memory_space<vmem>>, %arg7: memref<8x128xf32, #tpu.memory_space<vmem>>, %arg8: memref<8x128xf32, #tpu.memory_space<vmem>>) attributes {dimension_semantics = [#tpu.dimension_semantics<arbitrary>], iteration_bounds = array<i64: 1>, scalar_prefetch = 0 : i64, scratch_operands = 0 : i64, tpu.core_type = #tpu.core_type<tc>, window_params = [{pipeline_mode = #tpu.pipeline_mode<synchronous>, transform_indices = @transform_0, window_bounds = array<i64: 1, 128>}, {pipeline_mode = #tpu.pipeline_mode<synchronous>, transform_indices = @transform_1, window_bounds = array<i64: 1, 128>}, {pipeline_mode = #tpu.pipeline_mode<synchronous>, transform_indices = @transform_2, window_bounds = array<i64: 1, 128>}, {pipeline_mode = #tpu.pipeline_mode<synchronous>, transform_indices = @transform_3, window_bounds = array<i64: 8, 32>}, {pipeline_mode = #tpu.pipeline_mode<synchronous>, transform_indices = @transform_4, window_bounds = array<i64: 32, 1024>}, {pipeline_mode = #tpu.pipeline_mode<synchronous>, transform_indices = @transform_5, window_bounds = array<i64: 1, 1024>}, {pipeline_mode = #tpu.pipeline_mode<synchronous>, transform_indices = @transform_6, window_bounds = array<i64: 8, 128>}, {pipeline_mode = #tpu.pipeline_mode<synchronous>, transform_indices = @transform_7, window_bounds = array<i64: 8, 128>}]} {
    %c0 = arith.constant 0 : index
    %c0_0 = arith.constant 0 : index
    %0 = vector.load %arg4[%c0, %c0_0] : memref<8x32xbf16, #tpu.memory_space<vmem>>, vector<8x32xbf16>
    %c0_1 = arith.constant 0 : index
    %c0_2 = arith.constant 0 : index
    %1 = vector.load %arg5[%c0_1, %c0_2] : memref<32x1024xbf16, #tpu.memory_space<vmem>>, vector<32x1024xbf16>
    %cst = arith.constant dense<0.000000e+00> : vector<8x1024xf32>
    %2 = tpu.matmul %0, %1, %cst {dimension_numbers = #tpu.dot_dimension_numbers<[1], [0], [0], [1], [0, 0, 1, 1], [], []>} : vector<8x32xbf16>, vector<32x1024xbf16>, vector<8x1024xf32> -> vector<8x1024xf32>
    %c0_3 = arith.constant 0 : index
    %c0_4 = arith.constant 0 : index
    %3 = vector.load %arg6[%c0_3, %c0_4] : memref<1x1024xf32, #tpu.memory_space<vmem>>, vector<1x1024xf32>
    %4 = vector.broadcast %3 : vector<1x1024xf32> to vector<8x1024xf32>
    %5 = arith.addf %2, %4 : vector<8x1024xf32>
    %6 = tpu.iota {dimensions = array<i32: 0>} : vector<8x128xi32>
    %c0_5 = arith.constant 0 : index
    %c0_6 = arith.constant 0 : index
    %7 = vector.load %arg2[%c0_5, %c0_6] : memref<1x128xi32, #tpu.memory_space<vmem>>, vector<1x128xi32>
    %c0_7 = arith.constant 0 : index
    %c0_8 = arith.constant 0 : index
    %8 = vector.load %arg3[%c0_7, %c0_8] : memref<1x128xi32, #tpu.memory_space<vmem>>, vector<1x128xi32>
    %9 = vector.broadcast %7 : vector<1x128xi32> to vector<8x128xi32>
    %10 = arith.cmpi eq, %9, %6 : vector<8x128xi32>
    %c0_9 = arith.constant 0 : index
    %c0_10 = arith.constant 0 : index
    %11 = vector.load %arg1[%c0_9, %c0_10] : memref<1x128xi32, #tpu.memory_space<vmem>>, vector<1x128xi32>
    %12 = vector.broadcast %11 : vector<1x128xi32> to vector<8x128xi32>
    %13 = arith.cmpi eq, %12, %6 : vector<8x128xi32>
    %14 = arith.extui %13 : vector<8x128xi1> to vector<8x128xi32>
    %15 = arith.sitofp %14 : vector<8x128xi32> to vector<8x128xf32>
    %16 = arith.truncf %15 : vector<8x128xf32> to vector<8x128xbf16>
    %17 = vector.extract_strided_slice %5 {offsets = [0, 0], sizes = [8, 128], strides = [1, 1]} : vector<8x1024xf32> to vector<8x128xf32>
    %c1_i32 = arith.constant 1 : i32
    %18 = vector.broadcast %c1_i32 : i32 to vector<1x128xi32>
    %19 = arith.cmpi eq, %8, %18 : vector<1x128xi32>
    %20 = vector.broadcast %19 : vector<1x128xi1> to vector<8x128xi1>
    %21 = arith.andi %10, %20 : vector<8x128xi1>
    %22 = arith.extui %21 : vector<8x128xi1> to vector<8x128xi32>
    %23 = arith.sitofp %22 : vector<8x128xi32> to vector<8x128xf32>
    %24 = arith.truncf %23 : vector<8x128xf32> to vector<8x128xbf16>
    %cst_11 = arith.constant dense<0.000000e+00> : vector<8x8xf32>
    %25 = tpu.matmul %24, %16, %cst_11 {dimension_numbers = #tpu.dot_dimension_numbers<[1], [1], [0], [0], [0, 0, 1, 0], [], []>} : vector<8x128xbf16>, vector<8x128xbf16>, vector<8x8xf32> -> vector<8x8xf32>
    %26 = vector.extract_strided_slice %5 {offsets = [0, 128], sizes = [8, 128], strides = [1, 1]} : vector<8x1024xf32> to vector<8x128xf32>
    %cst_12 = arith.constant dense<0.000000e+00> : vector<8x128xf32>
    %27 = tpu.matmul %25, %26, %cst_12 {dimension_numbers = #tpu.dot_dimension_numbers<[1], [0], [0], [1], [0, 0, 1, 1], [], []>} : vector<8x8xf32>, vector<8x128xf32>, vector<8x128xf32> -> vector<8x128xf32>
    %28 = arith.addf %17, %27 : vector<8x128xf32>
    %c2_i32 = arith.constant 2 : i32
    %29 = vector.broadcast %c2_i32 : i32 to vector<1x128xi32>
    %30 = arith.cmpi eq, %8, %29 : vector<1x128xi32>
    %31 = vector.broadcast %30 : vector<1x128xi1> to vector<8x128xi1>
    %32 = arith.andi %10, %31 : vector<8x128xi1>
    %33 = arith.extui %32 : vector<8x128xi1> to vector<8x128xi32>
    %34 = arith.sitofp %33 : vector<8x128xi32> to vector<8x128xf32>
    %35 = arith.truncf %34 : vector<8x128xf32> to vector<8x128xbf16>
    %cst_13 = arith.constant dense<0.000000e+00> : vector<8x8xf32>
    %36 = tpu.matmul %35, %16, %cst_13 {dimension_numbers = #tpu.dot_dimension_numbers<[1], [1], [0], [0], [0, 0, 1, 0], [], []>} : vector<8x128xbf16>, vector<8x128xbf16>, vector<8x8xf32> -> vector<8x8xf32>
    %37 = vector.extract_strided_slice %5 {offsets = [0, 256], sizes = [8, 128], strides = [1, 1]} : vector<8x1024xf32> to vector<8x128xf32>
    %cst_14 = arith.constant dense<0.000000e+00> : vector<8x128xf32>
    %38 = tpu.matmul %36, %37, %cst_14 {dimension_numbers = #tpu.dot_dimension_numbers<[1], [0], [0], [1], [0, 0, 1, 1], [], []>} : vector<8x8xf32>, vector<8x128xf32>, vector<8x128xf32> -> vector<8x128xf32>
    %39 = arith.addf %28, %38 : vector<8x128xf32>
    %c3_i32 = arith.constant 3 : i32
    %40 = vector.broadcast %c3_i32 : i32 to vector<1x128xi32>
    %41 = arith.cmpi eq, %8, %40 : vector<1x128xi32>
    %42 = vector.broadcast %41 : vector<1x128xi1> to vector<8x128xi1>
    %43 = arith.andi %10, %42 : vector<8x128xi1>
    %44 = arith.extui %43 : vector<8x128xi1> to vector<8x128xi32>
    %45 = arith.sitofp %44 : vector<8x128xi32> to vector<8x128xf32>
    %46 = arith.truncf %45 : vector<8x128xf32> to vector<8x128xbf16>
    %cst_15 = arith.constant dense<0.000000e+00> : vector<8x8xf32>
    %47 = tpu.matmul %46, %16, %cst_15 {dimension_numbers = #tpu.dot_dimension_numbers<[1], [1], [0], [0], [0, 0, 1, 0], [], []>} : vector<8x128xbf16>, vector<8x128xbf16>, vector<8x8xf32> -> vector<8x8xf32>
    %48 = vector.extract_strided_slice %5 {offsets = [0, 384], sizes = [8, 128], strides = [1, 1]} : vector<8x1024xf32> to vector<8x128xf32>
    %cst_16 = arith.constant dense<0.000000e+00> : vector<8x128xf32>
    %49 = tpu.matmul %47, %48, %cst_16 {dimension_numbers = #tpu.dot_dimension_numbers<[1], [0], [0], [1], [0, 0, 1, 1], [], []>} : vector<8x8xf32>, vector<8x128xf32>, vector<8x128xf32> -> vector<8x128xf32>
    %50 = arith.addf %39, %49 : vector<8x128xf32>
    %c4_i32 = arith.constant 4 : i32
    %51 = vector.broadcast %c4_i32 : i32 to vector<1x128xi32>
    %52 = arith.cmpi eq, %8, %51 : vector<1x128xi32>
    %53 = vector.broadcast %52 : vector<1x128xi1> to vector<8x128xi1>
    %54 = arith.andi %10, %53 : vector<8x128xi1>
    %55 = arith.extui %54 : vector<8x128xi1> to vector<8x128xi32>
    %56 = arith.sitofp %55 : vector<8x128xi32> to vector<8x128xf32>
    %57 = arith.truncf %56 : vector<8x128xf32> to vector<8x128xbf16>
    %cst_17 = arith.constant dense<0.000000e+00> : vector<8x8xf32>
    %58 = tpu.matmul %57, %16, %cst_17 {dimension_numbers = #tpu.dot_dimension_numbers<[1], [1], [0], [0], [0, 0, 1, 0], [], []>} : vector<8x128xbf16>, vector<8x128xbf16>, vector<8x8xf32> -> vector<8x8xf32>
    %59 = vector.extract_strided_slice %5 {offsets = [0, 512], sizes = [8, 128], strides = [1, 1]} : vector<8x1024xf32> to vector<8x128xf32>
    %cst_18 = arith.constant dense<0.000000e+00> : vector<8x128xf32>
    %60 = tpu.matmul %58, %59, %cst_18 {dimension_numbers = #tpu.dot_dimension_numbers<[1], [0], [0], [1], [0, 0, 1, 1], [], []>} : vector<8x8xf32>, vector<8x128xf32>, vector<8x128xf32> -> vector<8x128xf32>
    %61 = arith.addf %50, %60 : vector<8x128xf32>
    %c5_i32 = arith.constant 5 : i32
    %62 = vector.broadcast %c5_i32 : i32 to vector<1x128xi32>
    %63 = arith.cmpi eq, %8, %62 : vector<1x128xi32>
    %64 = vector.broadcast %63 : vector<1x128xi1> to vector<8x128xi1>
    %65 = arith.andi %10, %64 : vector<8x128xi1>
    %66 = arith.extui %65 : vector<8x128xi1> to vector<8x128xi32>
    %67 = arith.sitofp %66 : vector<8x128xi32> to vector<8x128xf32>
    %68 = arith.truncf %67 : vector<8x128xf32> to vector<8x128xbf16>
    %cst_19 = arith.constant dense<0.000000e+00> : vector<8x8xf32>
    %69 = tpu.matmul %68, %16, %cst_19 {dimension_numbers = #tpu.dot_dimension_numbers<[1], [1], [0], [0], [0, 0, 1, 0], [], []>} : vector<8x128xbf16>, vector<8x128xbf16>, vector<8x8xf32> -> vector<8x8xf32>
    %70 = vector.extract_strided_slice %5 {offsets = [0, 640], sizes = [8, 128], strides = [1, 1]} : vector<8x1024xf32> to vector<8x128xf32>
    %cst_20 = arith.constant dense<0.000000e+00> : vector<8x128xf32>
    %71 = tpu.matmul %69, %70, %cst_20 {dimension_numbers = #tpu.dot_dimension_numbers<[1], [0], [0], [1], [0, 0, 1, 1], [], []>} : vector<8x8xf32>, vector<8x128xf32>, vector<8x128xf32> -> vector<8x128xf32>
    %72 = arith.addf %61, %71 : vector<8x128xf32>
    %c6_i32 = arith.constant 6 : i32
    %73 = vector.broadcast %c6_i32 : i32 to vector<1x128xi32>
    %74 = arith.cmpi eq, %8, %73 : vector<1x128xi32>
    %75 = vector.broadcast %74 : vector<1x128xi1> to vector<8x128xi1>
    %76 = arith.andi %10, %75 : vector<8x128xi1>
    %77 = arith.extui %76 : vector<8x128xi1> to vector<8x128xi32>
    %78 = arith.sitofp %77 : vector<8x128xi32> to vector<8x128xf32>
    %79 = arith.truncf %78 : vector<8x128xf32> to vector<8x128xbf16>
    %cst_21 = arith.constant dense<0.000000e+00> : vector<8x8xf32>
    %80 = tpu.matmul %79, %16, %cst_21 {dimension_numbers = #tpu.dot_dimension_numbers<[1], [1], [0], [0], [0, 0, 1, 0], [], []>} : vector<8x128xbf16>, vector<8x128xbf16>, vector<8x8xf32> -> vector<8x8xf32>
    %81 = vector.extract_strided_slice %5 {offsets = [0, 768], sizes = [8, 128], strides = [1, 1]} : vector<8x1024xf32> to vector<8x128xf32>
    %cst_22 = arith.constant dense<0.000000e+00> : vector<8x128xf32>
    %82 = tpu.matmul %80, %81, %cst_22 {dimension_numbers = #tpu.dot_dimension_numbers<[1], [0], [0], [1], [0, 0, 1, 1], [], []>} : vector<8x8xf32>, vector<8x128xf32>, vector<8x128xf32> -> vector<8x128xf32>
    %83 = arith.addf %72, %82 : vector<8x128xf32>
    %c7_i32 = arith.constant 7 : i32
    %84 = vector.broadcast %c7_i32 : i32 to vector<1x128xi32>
    %85 = arith.cmpi eq, %8, %84 : vector<1x128xi32>
    %86 = vector.broadcast %85 : vector<1x128xi1> to vector<8x128xi1>
    %87 = arith.andi %10, %86 : vector<8x128xi1>
    %88 = arith.extui %87 : vector<8x128xi1> to vector<8x128xi32>
    %89 = arith.sitofp %88 : vector<8x128xi32> to vector<8x128xf32>
    %90 = arith.truncf %89 : vector<8x128xf32> to vector<8x128xbf16>
    %cst_23 = arith.constant dense<0.000000e+00> : vector<8x8xf32>
    %91 = tpu.matmul %90, %16, %cst_23 {dimension_numbers = #tpu.dot_dimension_numbers<[1], [1], [0], [0], [0, 0, 1, 0], [], []>} : vector<8x128xbf16>, vector<8x128xbf16>, vector<8x8xf32> -> vector<8x8xf32>
    %92 = vector.extract_strided_slice %5 {offsets = [0, 896], sizes = [8, 128], strides = [1, 1]} : vector<8x1024xf32> to vector<8x128xf32>
    %cst_24 = arith.constant dense<0.000000e+00> : vector<8x128xf32>
    %93 = tpu.matmul %91, %92, %cst_24 {dimension_numbers = #tpu.dot_dimension_numbers<[1], [0], [0], [1], [0, 0, 1, 1], [], []>} : vector<8x8xf32>, vector<8x128xf32>, vector<8x128xf32> -> vector<8x128xf32>
    %94 = arith.addf %83, %93 : vector<8x128xf32>
    %cst_25 = arith.constant 0.000000e+00 : f32
    %95 = vector.broadcast %cst_25 : f32 to vector<8x128xf32>
    %96 = arith.maximumf %94, %95 : vector<8x128xf32>
    %c0_26 = arith.constant 0 : index
    %c0_27 = arith.constant 0 : index
    %97 = vector.load %arg7[%c0_26, %c0_27] : memref<8x128xf32, #tpu.memory_space<vmem>>, vector<8x128xf32>
    %98 = arith.mulf %96, %97 : vector<8x128xf32>
    %c0_28 = arith.constant 0 : index
    %c0_29 = arith.constant 0 : index
    %99 = vector.load %arg8[%c0_28, %c0_29] : memref<8x128xf32, #tpu.memory_space<vmem>>, vector<8x128xf32>
    tpu.vector_store %arg8[%c0_28, %c0_29], %98 {strides = array<i32>} : memref<8x128xf32, #tpu.memory_space<vmem>>, vector<8x128xf32>,
    return
  }
  func.func @transform_0(%arg0: i32) -> (i32, i32) {
    %c0_i32 = arith.constant 0 : i32
    %c0_i32_0 = arith.constant 0 : i32
    %c0_i32_1 = arith.constant 0 : i32
    return %c0_i32, %c0_i32_0 : i32, i32
  }
  func.func @transform_1(%arg0: i32) -> (i32, i32) {
    %c0_i32 = arith.constant 0 : i32
    %c0_i32_0 = arith.constant 0 : i32
    %c0_i32_1 = arith.constant 0 : i32
    return %c0_i32, %c0_i32_0 : i32, i32
  }
  func.func @transform_2(%arg0: i32) -> (i32, i32) {
    %c0_i32 = arith.constant 0 : i32
    %c0_i32_0 = arith.constant 0 : i32
    %c0_i32_1 = arith.constant 0 : i32
    return %c0_i32, %c0_i32_0 : i32, i32
  }
  func.func @transform_3(%arg0: i32) -> (i32, i32) {
    %c0_i32 = arith.constant 0 : i32
    %c0_i32_0 = arith.constant 0 : i32
    %c0_i32_1 = arith.constant 0 : i32
    return %c0_i32, %c0_i32_0 : i32, i32
  }
  func.func @transform_4(%arg0: i32) -> (i32, i32) {
    %c0_i32 = arith.constant 0 : i32
    %c0_i32_0 = arith.constant 0 : i32
    %c0_i32_1 = arith.constant 0 : i32
    return %c0_i32, %c0_i32_0 : i32, i32
  }
  func.func @transform_5(%arg0: i32) -> (i32, i32) {
    %c0_i32 = arith.constant 0 : i32
    %c0_i32_0 = arith.constant 0 : i32
    %c0_i32_1 = arith.constant 0 : i32
    return %c0_i32, %c0_i32_0 : i32, i32
  }
  func.func @transform_6(%arg0: i32) -> (i32, i32) {
    %c0_i32 = arith.constant 0 : i32
    %c0_i32_0 = arith.constant 0 : i32
    %c0_i32_1 = arith.constant 0 : i32
    return %c0_i32, %c0_i32_0 : i32, i32
  }
  func.func @transform_7(%arg0: i32) -> (i32, i32) {
    %c0_i32 = arith.constant 0 : i32
    %c0_i32_0 = arith.constant 0 : i32
    %c0_i32_1 = arith.constant 0 : i32
    return %c0_i32, %c0_i32_0 : i32, i32
  }
}

</mosaic_0001>

<bundles_post_ra>
// kernel: dep_gcn_forward.1
= control target key start
LH: loop header
LB: loop body
LE: loop exit
PB: predicated region body
PF: predicated region fallthrough
CT: control target
= control target key end

     0   :  { %12 = vsyncpa [#allocation3], 0  ;;  %s1717_s0 = inlined_call_operand.vmem [shape: s32[1,128], index: 0, kind: input, shape index: {}]   ;;  %s1718_s1 = inlined_call_operand.vmem [shape: s32[1,128], index: 1, kind: input, shape index: {}]   ;;  %s1719_s2 = inlined_call_operand.vmem [shape: s32[1,128], index: 2, kind: input, shape index: {}]   ;;  %s1720_s3 = inlined_call_operand.vmem [shape: bf16[8,32], index: 3, kind: input, shape index: {}]   ;;  %s1721_s4 = inlined_call_operand.hbm [shape: bf16[32,1024], index: 4, kind: input, shape index: {}]   ;;  %s1722_s5 = inlined_call_operand.vmem [shape: f32[1,1024], index: 5, kind: input, shape index: {}]   ;;  %s1723_s6 = inlined_call_operand.vmem [shape: f32[8,128], index: 6, kind: input, shape index: {}]   ;;  %s1724_s7 = inlined_call_operand.hbm [shape: f32[8,128], index: 7, kind: output, shape index: {}]  }
   0x1   :  { %13 = vsyncpa [#allocation4], 0  ;;  %s1484_s24 = smov [#allocation2]  }
   0x2   :  { %s27_s25 = sshll.u32 %s1484_s24, 4  ;;  %s28_s25 = int_to_ptr.vmem [resolvable:$true] %s27_s25 }
   0x3   :  { %s1448_s26 = scalar_lea.vmem %s28_s25, 2048  ;;  %p1453_p1 = scmp.lt.s32.totalorder %s28_s25, %s28_s25 }
   0x4   :  { %p1449_p0 = scmp.ne.s32.totalorder %s28_s25, %s1448_s26  ;;  %p1454_p2 = scmp.lt.s32.totalorder %s1448_s26, %s1448_s26 }
   0x6   :  { %p1455_p3 = por %p1454_p2, %p1453_p1 }
   0x8   :  { %p1456_p4 = pnand %p1455_p3, %p1449_p0 }
   0xa   :  { %1459 = shalt.err (!%p1456_p4)
}
   0xb   :  { %s1485_s27 = smov 512   ;;  %s1486_s28 = smov 32  }
   0xc   :  { %33 = dma.hbm_to_vmem [thread:$0]  %s1721_s4, 2048, %s28_s25, [#allocation3], %s1485_s27, %s1485_s27, %s1486_s28  }
   0xd   :  { %1480 = dma.done.wait [#allocation3], 2048  }
   0xe   :  { %1481 = vsyncadd [#allocation3], 4294965248  ;;  %v1487_v0 = vmov 0   ;;  %v51_v1 = vld [vmem:[#allocation2 + $0x40] sm:$0xff]  ;;  %v53_v8 = vld [vmem:[#allocation2 + $0x50] sm:$0xff]  ;;  %v61_v17 = vlaneseq  ;;  %vm181_vm0 = vcmask 261120  }
   0xf   :  { %217 = vmatprep.mubr.bf16.mxu0 %v1487_v0  ;;  %258 = vmatprep.mubr.bf16.mxu1 %v1487_v0  ;;  %v55_v2 = vld [vmem:[#allocation2 + $0x60] sm:$0xff]  ;;  %v57_v9 = vld [vmem:[#allocation2 + $0x70] sm:$0xff]  ;;  %v52_v10 = vld [vmem:[#allocation2 + $0x48] sm:$0xff]  ;;  %v1488_v38 = vmov 0.0   ;;  %v1489_v42 = vmov 1.0|1.0  }
  0x10   :  { %v43_v3 = vld [vmem:[#allocation2] sm:$0xff]  ;;  %v1271_v4 = vcombine.high %v51_v1, %v55_v2  ;;  %v1270_v5 = vcombine.low %v51_v1, %v55_v2  ;;  %v56_v11 = vld [vmem:[#allocation2 + $0x68] sm:$0xff]  ;;  %v1275_v18 = vcombine.high %v53_v8, %v57_v9  ;;  %v45_v19 = vld [vmem:[#allocation2 + $0x10] sm:$0xff]  ;;  %v1274_v27 = vcombine.low %v53_v8, %v57_v9  ;;  %s1491_s14 = smov [#allocation5]  }
  0x11   :  { %v47_v6 = vld [vmem:[#allocation2 + $0x20] sm:$0xff]  ;;  %v44_v12 = vld [vmem:[#allocation2 + $0x8] sm:$0xff]  ;;  %v1273_v14 = vcombine.high %v52_v10, %v56_v11  ;;  %v1272_v15 = vcombine.low %v52_v10, %v56_v11  ;;  %v49_v22 = vld [vmem:[#allocation2 + $0x30] sm:$0xff]  ;;  %v1545_v28 = vshrl.u32 %v61_v17, 7  ;;  %vm1490_vm7 = vmmov 0   ;;  %s1253_s15 = sshll.u32 %s1491_s14, 4  ;;  %s1254_s15 = int_to_ptr.vmem [resolvable:$true] %s1253_s15 }
  0x12   :  { %v1263_v7 = vcombine.high %v43_v3, %v47_v6  ;;  %197 = vmatprep.subr.bf16.mxu0 %v1271_v4  ;;  %v1262_v13 = vcombine.low %v43_v3, %v47_v6  ;;  %v48_v16 = vld [vmem:[#allocation2 + $0x28] sm:$0xff]  ;;  %v1540_v21 = vld [vmem:[%s1719_s2] sm:$0x1]  ;;  %v54_v23 = vld [vmem:[#allocation2 + $0x58] sm:$0xff]  ;;  %v1267_v29 = vcombine.high %v45_v19, %v49_v22  ;;  %v1266_v35 = vcombine.low %v45_v19, %v49_v22  ;;  %s1460_s16 = scalar_lea.vmem %s1254_s15, 128  ;;  %p1465_p6 = scmp.lt.s32.totalorder %s1254_s15, %s1254_s15 }
  0x13   :  { %198 = vmatpush1.bf16.msra.mxu0 %v1270_v5  ;;  %v1265_v20 = vcombine.high %v44_v12, %v48_v16  ;;  %238 = vmatprep.subr.bf16.mxu1 %v1273_v14  ;;  %v58_v24 = vld [vmem:[#allocation2 + $0x78] sm:$0xff]  ;;  %v1264_v25 = vcombine.low %v44_v12, %v48_v16  ;;  %v42_v26 = vld [vmem:[%s1720_s3] sm:$0xf]  ;;  %vm367_vm1 = vcmp.eq.s32.totalorder %v1540_v21, 1  ;;  %v1549_v31 = vsub.s32 0, %v1545_v28  ;;  %p1461_p5 = scmp.ne.s32.totalorder %s1254_s15, %s1460_s16  ;;  %p1466_p7 = scmp.lt.s32.totalorder %s1460_s16, %s1460_s16 }
  0x14   :  { %199 = vmatprep.subr.bf16.mxu0 %v1263_v7  ;;  %239 = vmatpush1.bf16.msra.mxu1 %v1272_v15  ;;  %v1277_v30 = vcombine.high %v54_v23, %v58_v24  ;;  %v1283_v32 = vld [vmem:[%s1717_s0] ss:$0 sm:$0xff]  ;;  %v368_v33 = vsel %vm367_vm1, 1, %v1487_v0  ;;  %v1276_v34 = vcombine.low %v54_v23, %v58_v24  ;;  %vm493_vm3 = vcmp.eq.s32.totalorder %v1540_v21, 2  ;;  %v46_v44 = vld [vmem:[#allocation2 + $0x18] sm:$0xff] }
  0x15   :  { %240 = vmatprep.subr.bf16.mxu1 %v1265_v20  ;;  %vm363_vm2 = vcmp.eq.s32.totalorder %v1283_v32, %v1545_v28  ;;  %v372_v36 = vrot.slane %v368_v33, %v1549_v31  ;;  %v1282_v37 = vld [vmem:[%s1718_s1] ss:$0 sm:$0xff]  ;;  %v494_v41 = vsel %vm493_vm3, 1, %v1487_v0  ;;  %v50_v45 = vld [vmem:[#allocation2 + $0x38] sm:$0xff]  ;;  %v67_v48 = vsub.s32 1, %v1545_v28  ;;  %p1467_p8 = por %p1466_p7, %p1465_p6 }
  0x16   :  { %vm1566_vm4 = vmpackc.low %vm363_vm2, %vm363_vm2  ;;  %vm1571_vm5 = vcmp.eq.s32.totalorder %v1282_v37, %v1545_v28  ;;  %v498_v43 = vrot.slane %v494_v41, %v1549_v31  ;;  %v1269_v46 = vcombine.high %v46_v44, %v50_v45  ;;  %v1268_v47 = vcombine.low %v46_v44, %v50_v45  ;;  %v1606_v49 = vld [vmem:[%s1722_s5] sm:$0xff] }
  0x17   :  { %200 = vmatpush1.bf16.msra.mxu0 %v1262_v13  ;;  %vm373_vm6 = vcmp.eq.s32.totalorder %v372_v36, 1  ;;  %v75_v50 = vsub.s32 3, %v1545_v28  ;;  %v68_v51 = vrot.slane %v1606_v49, %v67_v48  ;;  %v71_v60 = vsub.s32 2, %v1545_v28  ;;  %p1468_p9 = pnand %p1467_p8, %p1461_p5 }
  0x18   :  { %279 = vmatprep.subr.bf16.mxu0 %v1275_v18  ;;  %241 = vmatpush1.bf16.msra.mxu1 %v1264_v25  ;;  %vm374_vm8 = vmand %vm1571_vm5, %vm373_vm6  ;;  %vm499_vm10 = vcmp.eq.s32.totalorder %v498_v43, 1  ;;  %vm418_vm13 = vcmask 64512   ;;  %vm618_vm14 = vcmp.eq.s32.totalorder %v1540_v21, 3  ;;  %vm743_vm15 = vcmp.eq.s32.totalorder %v1540_v21, 4 }
  0x19   :  { %320 = vmatprep.subr.bf16.mxu1 %v1277_v30  ;;  %vm1288_vm9 = vmpackc.low %vm374_vm8, %vm374_vm8  ;;  %v76_v54 = vrot.slane %v1606_v49, %v75_v50  ;;  %v72_v3 = vrot.slane %v1606_v49, %v71_v60  ;;  %v619_v8 = vsel %vm618_vm14, 1, %v1487_v0  ;;  %v744_v14 = vsel %vm743_vm15, 1, %v1487_v0 }
  0x1a   :  { %1278 = vmatmul.mubr.msk.bf16.vlgmr.msra.gmra.mxu0 %vm181_vm0, %v42_v26  ;;  %vm500_vm11 = vmand %vm1571_vm5, %vm499_vm10  ;;  %v623_v11 = vrot.slane %v619_v8, %v1549_v31  ;;  %v748_v17 = vrot.slane %v744_v14, %v1549_v31  ;;  %v83_v19 = vsub.s32 5, %v1545_v28  ;;  %vm993_vm10 = vcmp.eq.s32.totalorder %v1540_v21, 6 }
  0x1b   :  { %280 = vmatpush1.bf16.msra.mxu0 %v1274_v27  ;;  %299 = vmatprep.mubr.bf16.mxu0 %v1487_v0  ;;  %vm1294_vm12 = vmpackc.low %vm500_vm11, %vm500_vm11  ;;  %v64_v27 = vrot.slane %v1606_v49, %v1549_v31 }
  0x1c   :  { %281 = vmatprep.subr.bf16.mxu0 %v1267_v29  ;;  %1279 = vmatmul.mubr.msk.bf16.vlgmr.msra.gmra.mxu1 %vm181_vm0, %v42_v26  ;;  %vm749_vm3 = vcmp.eq.s32.totalorder %v748_v17, 1  ;;  %v84_v20 = vrot.slane %v1606_v49, %v83_v19 }
  0x1d   :  { %321 = vmatpush1.bf16.msra.mxu1 %v1276_v34  ;;  %340 = vmatprep.mubr.bf16.mxu1 %v1487_v0  ;;  %vm750_vm6 = vmand %vm1571_vm5, %vm749_vm3  ;;  %v79_v34 = vsub.s32 4, %v1545_v28 }
  0x1e   :  { %322 = vmatprep.subr.bf16.mxu1 %v1269_v46  ;;  %vm1306_vm8 = vmpackc.low %vm750_vm6, %vm750_vm6 }
  0x1f   :  { %282 = vmatpush1.bf16.msra.mxu0 %v1266_v35  ;;  %v80_v41 = vrot.slane %v1606_v49, %v79_v34 }
  0x20   :  { %1355 = vmatprep.subr.bf16.mxu0 %v1488_v38 }
  0x21   :  { %323 = vmatpush1.bf16.msra.mxu1 %v1268_v47 }
  0x22   :  { %1280 = vmatmul.mubr.msk.bf16.vlgmr.msra.gmra.mxu0 %vm181_vm0, %v42_v26  ;;  %1361 = vmatprep.subr.mxu1 %v1488_v38 }
  0x23   :  { %1356 = vmatpush3.bf16.xpose.msk.msra.mxu0 %vm1566_vm4, %v1489_v42  ;;  %1357 = vmatprep.mubr.msk.bf16.mxu0 %vm1490_vm7, %v1488_v38 }
  0x24   :  { %1366 = vmatprep.subr.bf16.mxu0 %v1488_v38  ;;  %1281 = vmatmul.mubr.msk.bf16.vlgmr.msra.gmra.mxu1 %vm181_vm0, %v42_v26  ;;  %vm624_vm0 = vcmp.eq.s32.totalorder %v623_v11, 1 }
  0x25   :  { %1363 = vmatprep.mubr.msk.f32.mxu1 %vm1490_vm7, %v1488_v38  ;;  %vm625_vm1 = vmand %vm1571_vm5, %vm624_vm0 }
  0x26   :  { %vm1300_vm2 = vmpackc.low %vm625_vm1, %vm625_vm1 }
  0x2a   :  { %1358 = vmatmul.mubr.msk.bf16.vlgmr.msra.gmra.mxu0 %vm1288_vm9, %v1489_v42  ;;  %vm868_vm9 = vcmp.eq.s32.totalorder %v1540_v21, 5 }
  0x2b   :  { %1367 = vmatpush3.bf16.xpose.msk.msra.mxu0 %vm1566_vm4, %v1489_v42  ;;  %1368 = vmatprep.mubr.msk.bf16.mxu0 %vm1490_vm7, %v1488_v38  ;;  %v869_v45 = vsel %vm868_vm9, 1, %v1487_v0 }
  0x2c   :  { %1383 = vmatprep.subr.mxu0 %v1488_v38  ;;  %v873_v48 = vrot.slane %v869_v45, %v1549_v31 }
  0x2e   :  { %vm874_vm11 = vcmp.eq.s32.totalorder %v873_v48, 1 }
  0x32   :  { %1369 = vmatmul.mubr.msk.bf16.vlgmr.msra.gmra.mxu0 %vm1294_vm12, %v1489_v42  ;;  %vm875_vm12 = vmand %vm1571_vm5, %vm874_vm11 }
  0x33   :  { %1385 = vmatprep.mubr.msk.f32.mxu0 %vm1490_vm7, %v1488_v38  ;;  %vm1312_vm14 = vmpackc.low %vm875_vm12, %vm875_vm12 }
  0xda   :  { %v1610_v52 = vpop.f32.mrf.mxu0 }
  0xdb   :  { %v220_v29 = vadd.f32 %v1610_v52, %v64_v27  ;;  %v994_v52 = vsel %vm993_vm10, 1, %v1487_v0 }
  0xdc   :  { %v221_v53 = vpop.f32.mrf.mxu0  ;;  %v260_v56 = vpop.f32.mrf.mxu1 }
  0xdd   :  { %v222_v55 = vadd.f32 %v221_v53, %v68_v51  ;;  %v261_v5 = vadd.f32 %v260_v56, %v72_v3 }
  0xde   :  { %v223_v57 = vpop.f32.mrf.mxu0  ;;  %v262_v58 = vpop.f32.mrf.mxu1 }
  0xdf   :  { %1362 = vmatpush3.msra.mxu1 %v222_v55  ;;  %v263_v61 = vadd.f32 %v262_v58, %v76_v54  ;;  %v998_v55 = vrot.slane %v994_v52, %v1549_v31  ;;  %v91_v57 = vsub.s32 7, %v1545_v28 }
  0xe0   :  { %v224_v59 = vpop.f32.mrf.mxu0  ;;  %1372 = vmatprep.subr.mxu1 %v1488_v38  ;;  %v264_v62 = vpop.f32.mrf.mxu1 }
  0xe1   :  { %1384 = vmatpush3.msra.mxu0 %v263_v61  ;;  %vm999_vm15 = vcmp.eq.s32.totalorder %v998_v55, 1  ;;  %v92_v58 = vrot.slane %v1606_v49, %v91_v57 }
  0xe2   :  { %v1615_v63 = vpop.f32.mrf.mxu0  ;;  %v265_v1 = vpop.f32.mrf.mxu1  ;;  %1394 = vmatprep.subr.mxu0 %v1488_v38  ;;  %vm1000_vm0 = vmand %vm1571_vm5, %vm999_vm15 }
  0xe3   :  { %v302_v43 = vadd.f32 %v1615_v63, %v80_v41  ;;  %vm1318_vm1 = vmpackc.low %vm1000_vm0, %vm1000_vm0  ;;  %v87_v63 = vsub.s32 6, %v1545_v28 }
  0xe4   :  { %v303_v2 = vpop.f32.mrf.mxu0  ;;  %v342_v23 = vpop.f32.mrf.mxu1 }
  0xe5   :  { %v304_v22 = vadd.f32 %v303_v2, %v84_v20  ;;  %v1244_v20 = vld [vmem:[%s1723_s6] sm:$0xff] }
  0xe6   :  { %v305_v4 = vpop.f32.mrf.mxu0  ;;  %v344_v24 = vpop.f32.mrf.mxu1 }
  0xe7   :  { %v345_v59 = vadd.f32 %v344_v24, %v92_v58  ;;  %v88_v4 = vrot.slane %v1606_v49, %v87_v63 }
  0xe8   :  { %v306_v6 = vpop.f32.mrf.mxu0  ;;  %v346_v25 = vpop.f32.mrf.mxu1 }
  0xea   :  { %v412_v7 = vpop.f32.mrf.mxu0  ;;  %v347_v26 = vpop.f32.mrf.mxu1 }
  0xeb   :  { %1364 = vmatmul.mubr.msk.f32.vlgmr.msra.gmra.mxu1 %vm418_vm13, %v412_v7 }
  0xec   :  { %v1359_v9 = vpop.f32.mrf.mxu0  ;;  %1373 = vmatpush3.msra.mxu1 %v261_v5  ;;  %1374 = vmatprep.mubr.msk.f32.mxu1 %vm1490_vm7, %v1488_v38  ;;  %v343_v5 = vadd.f32 %v342_v23, %v88_v4 }
  0xed   :  { %1377 = vmatprep.subr.bf16.mxu1 %v1488_v38 }
  0xee   :  { %v415_v10 = vpop.f32.mrf.mxu0 }
  0xf0   :  { %v1360_v12 = vpop.f32.mrf.mxu0 }
  0xf2   :  { %v538_v13 = vpop.f32.mrf.mxu0 }
  0xf3   :  { %1375 = vmatmul.mubr.msk.f32.vlgmr.msra.gmra.mxu1 %vm418_vm13, %v538_v13 }
  0xf4   :  { %1378 = vmatpush3.bf16.xpose.msk.msra.mxu1 %vm1566_vm4, %v1489_v42  ;;  %v1370_v15 = vpop.f32.mrf.mxu0  ;;  %1379 = vmatprep.mubr.msk.bf16.mxu1 %vm1490_vm7, %v1488_v38 }
  0xf5   :  { %1388 = vmatprep.subr.bf16.mxu1 %v1488_v38 }
  0xf6   :  { %v541_v16 = vpop.f32.mrf.mxu0 }
  0xf8   :  { %v1371_v18 = vpop.f32.mrf.mxu0 }
  0xfb   :  { %1380 = vmatmul.mubr.msk.bf16.vlgmr.msra.gmra.mxu1 %vm1300_vm2, %v1489_v42  ;;  %vm1118_vm2 = vcmp.eq.s32.totalorder %v1540_v21, 7 }
  0xfc   :  { %1389 = vmatpush3.bf16.xpose.msk.msra.mxu1 %vm1566_vm4, %v1489_v42  ;;  %1390 = vmatprep.mubr.msk.bf16.mxu1 %vm1490_vm7, %v1488_v38  ;;  %v1119_v7 = vsel %vm1118_vm2, 1, %v1487_v0 }
  0xfd   :  { %1405 = vmatprep.subr.mxu1 %v1488_v38  ;;  %v1123_v9 = vrot.slane %v1119_v7, %v1549_v31 }
  0xff   :  { %vm1124_vm3 = vcmp.eq.s32.totalorder %v1123_v9, 1 }
 0x100   :  { %vm1125_vm6 = vmand %vm1571_vm5, %vm1124_vm3 }
 0x103   :  { %1391 = vmatmul.mubr.msk.bf16.vlgmr.msra.gmra.mxu1 %vm1306_vm8, %v1489_v42  ;;  %vm1324_vm8 = vmpackc.low %vm1125_vm6, %vm1125_vm6 }
 0x104   :  { %1406 = vmatpush3.msra.mxu1 %v304_v22  ;;  %1407 = vmatprep.mubr.msk.f32.mxu1 %vm1490_vm7, %v1488_v38 }
 0x105   :  { %1416 = vmatprep.subr.mxu1 %v1488_v38 }
 0x1ab   :  { %v488_v30 = vpop.f32.mrf.mxu1 }
 0x1ac   :  { %v492_v32 = vadd.f32 %v488_v30, %v220_v29 }
 0x1ad   :  { %v1365_v33 = vpop.f32.mrf.mxu1 }
 0x1b3   :  { %v613_v35 = vpop.f32.mrf.mxu1 }
 0x1b4   :  { %v617_v36 = vadd.f32 %v613_v35, %v492_v32 }
 0x1b5   :  { %v1376_v37 = vpop.f32.mrf.mxu1 }
 0x1bb   :  { %v663_v44 = vpop.f32.mrf.mxu1 }
 0x1bc   :  { %1386 = vmatmul.mubr.msk.f32.vlgmr.msra.gmra.mxu0 %vm418_vm13, %v663_v44 }
 0x1bd   :  { %1395 = vmatpush3.msra.mxu0 %v302_v43  ;;  %v1381_v46 = vpop.f32.mrf.mxu1  ;;  %1396 = vmatprep.mubr.msk.f32.mxu0 %vm1490_vm7, %v1488_v38 }
 0x1be   :  { %1399 = vmatprep.subr.bf16.mxu0 %v1488_v38 }
 0x1bf   :  { %v666_v47 = vpop.f32.mrf.mxu1 }
 0x1c1   :  { %v1382_v50 = vpop.f32.mrf.mxu1 }
 0x1c3   :  { %v788_v51 = vpop.f32.mrf.mxu1 }
 0x1c4   :  { %1397 = vmatmul.mubr.msk.f32.vlgmr.msra.gmra.mxu0 %vm418_vm13, %v788_v51 }
 0x1c5   :  { %1400 = vmatpush3.bf16.xpose.msk.msra.mxu0 %vm1566_vm4, %v1489_v42  ;;  %v1392_v53 = vpop.f32.mrf.mxu1  ;;  %1401 = vmatprep.mubr.msk.bf16.mxu0 %vm1490_vm7, %v1488_v38 }
 0x1c6   :  { %1410 = vmatprep.subr.bf16.mxu0 %v1488_v38 }
 0x1c7   :  { %v791_v54 = vpop.f32.mrf.mxu1 }
 0x1c9   :  { %v1393_v56 = vpop.f32.mrf.mxu1 }
 0x1cc   :  { %1402 = vmatmul.mubr.msk.bf16.vlgmr.msra.gmra.mxu0 %vm1312_vm14, %v1489_v42 }
 0x1cd   :  { %1411 = vmatpush3.bf16.xpose.msk.msra.mxu0 %vm1566_vm4, %v1489_v42  ;;  %1412 = vmatprep.mubr.msk.bf16.mxu0 %vm1490_vm7, %v1488_v38 }
 0x1ce   :  { %1427 = vmatprep.subr.mxu0 %v1488_v38 }
 0x1d4   :  { %1413 = vmatmul.mubr.msk.bf16.vlgmr.msra.gmra.mxu0 %vm1318_vm1, %v1489_v42 }
 0x1d5   :  { %1428 = vmatpush3.msra.mxu0 %v345_v59  ;;  %1429 = vmatprep.mubr.msk.f32.mxu0 %vm1490_vm7, %v1488_v38 }
 0x27c   :  { %v738_v60 = vpop.f32.mrf.mxu0 }
 0x27d   :  { %v742_v61 = vadd.f32 %v738_v60, %v617_v36 }
 0x27e   :  { %v1387_v62 = vpop.f32.mrf.mxu0 }
 0x284   :  { %v863_v1 = vpop.f32.mrf.mxu0 }
 0x285   :  { %v867_v2 = vadd.f32 %v863_v1, %v742_v61 }
 0x286   :  { %v1398_v3 = vpop.f32.mrf.mxu0 }
 0x28c   :  { %v913_v6 = vpop.f32.mrf.mxu0 }
 0x28d   :  { %1408 = vmatmul.mubr.msk.f32.vlgmr.msra.gmra.mxu1 %vm418_vm13, %v913_v6 }
 0x28e   :  { %1417 = vmatpush3.msra.mxu1 %v343_v5  ;;  %v1403_v8 = vpop.f32.mrf.mxu0  ;;  %1418 = vmatprep.mubr.msk.f32.mxu1 %vm1490_vm7, %v1488_v38 }
 0x28f   :  { %1421 = vmatprep.subr.bf16.mxu1 %v1488_v38 }
 0x290   :  { %v916_v28 = vpop.f32.mrf.mxu0 }
 0x292   :  { %v1404_v10 = vpop.f32.mrf.mxu0 }
 0x294   :  { %v1038_v49 = vpop.f32.mrf.mxu0 }
 0x295   :  { %1419 = vmatmul.mubr.msk.f32.vlgmr.msra.gmra.mxu1 %vm418_vm13, %v1038_v49 }
 0x296   :  { %1422 = vmatpush3.bf16.xpose.msk.msra.mxu1 %vm1566_vm4, %v1489_v42  ;;  %v1414_v0 = vpop.f32.mrf.mxu0  ;;  %1423 = vmatprep.mubr.msk.bf16.mxu1 %vm1490_vm7, %v1488_v38 }
 0x298   :  { %v1041_v21 = vpop.f32.mrf.mxu0 }
 0x29a   :  { %v1415_v11 = vpop.f32.mrf.mxu0 }
 0x29d   :  { %1424 = vmatmul.mubr.msk.bf16.vlgmr.msra.gmra.mxu1 %vm1324_vm8, %v1489_v42 }
 0x34d   :  { %v988_v31 = vpop.f32.mrf.mxu1 }
 0x34e   :  { %v992_v12 = vadd.f32 %v988_v31, %v867_v2 }
 0x34f   :  { %v1409_v13 = vpop.f32.mrf.mxu1 }
 0x355   :  { %v1113_v14 = vpop.f32.mrf.mxu1 }
 0x356   :  { %v1117_v15 = vadd.f32 %v1113_v14, %v992_v12 }
 0x357   :  { %v1420_v16 = vpop.f32.mrf.mxu1 }
 0x35d   :  { %v1163_v39 = vpop.f32.mrf.mxu1 }
 0x35e   :  { %1430 = vmatmul.mubr.msk.f32.vlgmr.msra.gmra.mxu0 %vm418_vm13, %v1163_v39 }
 0x35f   :  { %v1425_v17 = vpop.f32.mrf.mxu1 }
 0x361   :  { %v1166_v18 = vpop.f32.mrf.mxu1 }
 0x363   :  { %v1426_v38 = vpop.f32.mrf.mxu1 }
 0x41e   :  { %v1238_v19 = vpop.f32.mrf.mxu0 }
 0x41f   :  { %v1242_v40 = vadd.f32 %v1238_v19, %v1117_v15 }
 0x420   :  { %v1431_v22 = vpop.f32.mrf.mxu0 }
 0x421   :  { %v1243_v42 = vmax.f32 %v1242_v40, 0.0 }
 0x423   :  { %v1245_v23 = vmul.f32 %v1244_v20, %v1243_v42 }
 0x425   :  { %1246 = vst [vmem:[#allocation5] sm:$0xff] %v1245_v23 }
 0x426   :  { %1471 = shalt.err (!%p1468_p9)
}
 0x427   :  { %1256 = dma.vmem_to_hbm [thread:$0]  %s1254_s15, 128, %s1724_s7, [#allocation4]  }
 0x428   :  { %1482 = dma.done.wait [#allocation4], 128  }
 0x429   :  { %1483 = vsyncadd [#allocation4], 4294967168 }
 0x42a   :  { %1260 = vsyncpa [#allocation3], 1 }
 0x42b   :  { %1261 = vsyncpa [#allocation4], 1 }

</bundles_post_ra>
